<compile_context>
chip_gen: v7x
topology: tpu7x:2x2x1
jax: 0.10.0
libtpu: 0.0.40
codegen_flags: <defaults>
</compile_context>

<pallas_src>
import functools

import jax
import jax.numpy as jnp
from jax.experimental import pallas as pl
from jax.experimental.pallas import tpu as pltpu  # noqa: F401  (imported per template)


def _round_up(x, m):
    return ((x + m - 1) // m) * m


def policy_net_kernel(x_ref, w_ref, b_ref, o_ref, *, num_inputs):
    """3-layer MLP forward.

    x_ref : (B, num_inputs)  f32
    w_ref : (3, D, D)        f32  packed weights, zero-padded to a common D
    b_ref : (3, 1, D)        f32  packed biases,  zero-padded
    o_ref : (B, D)           f32  softmax(dim=0); first num_actions cols valid
    """
    x = x_ref[...]

    # layer 1 + ReLU: only the first num_inputs rows of w_ref[0] are real.
    w1 = w_ref[0][:num_inputs, :]
    h1 = jnp.dot(x, w1, preferred_element_type=jnp.float32) + b_ref[0]
    h1 = jnp.maximum(h1, 0.0)

    # layer 2 + ReLU (padded cols of h1 are zero, padded rows of w2 are zero).
    h2 = jnp.dot(h1, w_ref[1], preferred_element_type=jnp.float32) + b_ref[1]
    h2 = jnp.maximum(h2, 0.0)

    # layer 3 + softmax over dim=0 (batch axis), matching F.softmax(..., dim=0).
    # Padded action columns have zero weights/bias -> logits 0; they are
    # independent under the dim=0 softmax and are sliced off by the caller.
    logits = jnp.dot(h2, w_ref[2], preferred_element_type=jnp.float32) + b_ref[2]
    m = jnp.max(logits, axis=0, keepdims=True)
    e = jnp.exp(logits - m)
    s = jnp.sum(e, axis=0, keepdims=True)
    o_ref[...] = e / s  # exact normalization: each column sums to 1


def prepare_params(params, num_inputs, num_actions, hidden_size):
    """Pack and zero-pad the six Linear params ONCE (outside the hot loop)."""
    w1, b1, w2, b2, w3, b3 = params
    D = _round_up(max(num_inputs, hidden_size, num_actions), 8)

    w_stack = jnp.zeros((3, D, D), jnp.float32)
    w_stack = w_stack.at[0, :num_inputs, :hidden_size].set(w1.astype(jnp.float32))
    w_stack = w_stack.at[1, :hidden_size, :hidden_size].set(w2.astype(jnp.float32))
    w_stack = w_stack.at[2, :hidden_size, :num_actions].set(w3.astype(jnp.float32))

    b_stack = jnp.zeros((3, 1, D), jnp.float32)
    b_stack = b_stack.at[0, :, :hidden_size].set(b1.astype(jnp.float32))
    b_stack = b_stack.at[1, :, :hidden_size].set(b2.astype(jnp.float32))
    b_stack = b_stack.at[2, :, :num_actions].set(b3.astype(jnp.float32))

    return w_stack, b_stack


@functools.partial(jax.jit, static_argnames=("num_inputs", "num_actions"))
def policy_net_forward(state, w_stack, b_stack, *, num_inputs, num_actions):
    """state: [B, num_inputs] f32. Returns softmax(dim=0) probs [B, num_actions]."""
    B = state.shape[0]
    assert B >= 1, "empty batch not supported"
    D = w_stack.shape[-1]

    full = lambda shape: pl.BlockSpec(shape, lambda: (0,) * len(shape))

    kernel = functools.partial(policy_net_kernel, num_inputs=num_inputs)

    out = pl.pallas_call(
        kernel,
        out_shape=jax.ShapeDtypeStruct((B, D), jnp.float32),
        in_specs=[full((B, num_inputs)), full(w_stack.shape), full(b_stack.shape)],
        out_specs=full((B, D)),
    )(state.astype(jnp.float32), w_stack, b_stack)

    # TODO(synk): in a tight RL loop, keep probs in the padded (B, D) layout
    # end-to-end and drop this slice.
    return out[:, :num_actions]


def init_params(key, num_inputs, num_actions, hidden_size):
    """Deterministic init mimicking nn.Linear's uniform(-1/sqrt(fan_in), 1/sqrt(fan_in)).
    Weights are returned already transposed to [in, out]; biases are [1, out]."""
    ks = jax.random.split(key, 6)

    def linear(kw, kb, fan_in, fan_out):
        bound = 1.0 / jnp.sqrt(jnp.float32(fan_in))
        w = jax.random.uniform(kw, (fan_in, fan_out), jnp.float32, -bound, bound)
        b = jax.random.uniform(kb, (1, fan_out), jnp.float32, -bound, bound)
        return w, b

    w1, b1 = linear(ks[0], ks[1], num_inputs, hidden_size)
    w2, b2 = linear(ks[2], ks[3], hidden_size, hidden_size)
    w3, b3 = linear(ks[4], ks[5], hidden_size, num_actions)
    return (w1, b1, w2, b2, w3, b3)


def reference_forward(state, params):
    w1, b1, w2, b2, w3, b3 = params
    hi = jax.lax.Precision.HIGHEST
    h1 = jnp.maximum(jnp.dot(state, w1, precision=hi) + b1, 0.0)
    h2 = jnp.maximum(jnp.dot(h1, w2, precision=hi) + b2, 0.0)
    logits = jnp.dot(h2, w3, precision=hi) + b3
    return jax.nn.softmax(logits, axis=0)


if __name__ == "__main__":
    num_inputs, num_actions, hidden_size, batch = 16, 8, 32, 2

    key = jax.random.PRNGKey(0)
    k_state, k_params = jax.random.split(key)

    state = jax.random.normal(k_state, (batch, num_inputs), jnp.float32)
    params = init_params(k_params, num_inputs, num_actions, hidden_size)

    # Pack / pad the weights ONCE, outside the per-step path.
    w_stack, b_stack = prepare_params(params, num_inputs, num_actions, hidden_size)

    probs = policy_net_forward(state, w_stack, b_stack,
                               num_inputs=num_inputs, num_actions=num_actions)
    probs = jax.block_until_ready(probs)

    ref = reference_forward(state, params)
    assert probs.shape == (batch, num_actions)
    assert jnp.allclose(probs, ref, atol=1e-4, rtol=1e-4), "mismatch vs reference"
    # dim=0 softmax: each action column's probs sum to 1 across the batch
    assert jnp.allclose(jnp.sum(probs, axis=0), jnp.ones((num_actions,)), atol=1e-5)

    print("KERNEL_OK")
</pallas_src>

<mosaic_0001>
module attributes {stable_mosaic.version = 11 : i64} {
  func.func @policy_net_kernel(%arg0: memref<2x16xf32, #tpu.memory_space<vmem>>, %arg1: memref<3x32x32xf32, #tpu.memory_space<vmem>>, %arg2: memref<3x1x32xf32, #tpu.memory_space<vmem>>, %arg3: memref<2x32xf32, #tpu.memory_space<vmem>>) attributes {dimension_semantics = [], scalar_prefetch = 0 : i64, scratch_operands = 0 : i64, tpu.core_type = #tpu.core_type<tc>} {
    %c0 = arith.constant 0 : index
    %c0_0 = arith.constant 0 : index
    %0 = vector.load %arg0[%c0, %c0_0] : memref<2x16xf32, #tpu.memory_space<vmem>>, vector<2x16xf32>
    %c0_1 = arith.constant 0 : index
    %c0_2 = arith.constant 0 : index
    %c0_3 = arith.constant 0 : index
    %1 = vector.load %arg1[%c0_1, %c0_2, %c0_3] : memref<3x32x32xf32, #tpu.memory_space<vmem>>, vector<1x32x32xf32>
    %2 = vector.shape_cast %1 : vector<1x32x32xf32> to vector<32x32xf32>
    %3 = vector.extract_strided_slice %2 {offsets = [0, 0], sizes = [16, 32], strides = [1, 1]} : vector<32x32xf32> to vector<16x32xf32>
    %cst = arith.constant dense<0.000000e+00> : vector<2x32xf32>
    %4 = tpu.matmul %0, %3, %cst {dimension_numbers = #tpu.dot_dimension_numbers<[1], [0], [0], [1], [0, 0, 1, 1], [], []>} : vector<2x16xf32>, vector<16x32xf32>, vector<2x32xf32> -> vector<2x32xf32>
    %c0_4 = arith.constant 0 : index
    %c0_5 = arith.constant 0 : index
    %c0_6 = arith.constant 0 : index
    %5 = vector.load %arg2[%c0_4, %c0_5, %c0_6] : memref<3x1x32xf32, #tpu.memory_space<vmem>>, vector<1x1x32xf32>
    %6 = vector.shape_cast %5 : vector<1x1x32xf32> to vector<1x32xf32>
    %7 = vector.broadcast %6 : vector<1x32xf32> to vector<2x32xf32>
    %8 = arith.addf %4, %7 : vector<2x32xf32>
    %cst_7 = arith.constant 0.000000e+00 : f32
    %9 = vector.broadcast %cst_7 : f32 to vector<2x32xf32>
    %10 = arith.maximumf %8, %9 : vector<2x32xf32>
    %c1 = arith.constant 1 : index
    %c0_8 = arith.constant 0 : index
    %c0_9 = arith.constant 0 : index
    %11 = vector.load %arg1[%c1, %c0_8, %c0_9] : memref<3x32x32xf32, #tpu.memory_space<vmem>>, vector<1x32x32xf32>
    %12 = vector.shape_cast %11 : vector<1x32x32xf32> to vector<32x32xf32>
    %cst_10 = arith.constant dense<0.000000e+00> : vector<2x32xf32>
    %13 = tpu.matmul %10, %12, %cst_10 {dimension_numbers = #tpu.dot_dimension_numbers<[1], [0], [0], [1], [0, 0, 1, 1], [], []>} : vector<2x32xf32>, vector<32x32xf32>, vector<2x32xf32> -> vector<2x32xf32>
    %c1_11 = arith.constant 1 : index
    %c0_12 = arith.constant 0 : index
    %c0_13 = arith.constant 0 : index
    %14 = vector.load %arg2[%c1_11, %c0_12, %c0_13] : memref<3x1x32xf32, #tpu.memory_space<vmem>>, vector<1x1x32xf32>
    %15 = vector.shape_cast %14 : vector<1x1x32xf32> to vector<1x32xf32>
    %16 = vector.broadcast %15 : vector<1x32xf32> to vector<2x32xf32>
    %17 = arith.addf %13, %16 : vector<2x32xf32>
    %cst_14 = arith.constant 0.000000e+00 : f32
    %18 = vector.broadcast %cst_14 : f32 to vector<2x32xf32>
    %19 = arith.maximumf %17, %18 : vector<2x32xf32>
    %c2 = arith.constant 2 : index
    %c0_15 = arith.constant 0 : index
    %c0_16 = arith.constant 0 : index
    %20 = vector.load %arg1[%c2, %c0_15, %c0_16] : memref<3x32x32xf32, #tpu.memory_space<vmem>>, vector<1x32x32xf32>
    %21 = vector.shape_cast %20 : vector<1x32x32xf32> to vector<32x32xf32>
    %cst_17 = arith.constant dense<0.000000e+00> : vector<2x32xf32>
    %22 = tpu.matmul %19, %21, %cst_17 {dimension_numbers = #tpu.dot_dimension_numbers<[1], [0], [0], [1], [0, 0, 1, 1], [], []>} : vector<2x32xf32>, vector<32x32xf32>, vector<2x32xf32> -> vector<2x32xf32>
    %c2_18 = arith.constant 2 : index
    %c0_19 = arith.constant 0 : index
    %c0_20 = arith.constant 0 : index
    %23 = vector.load %arg2[%c2_18, %c0_19, %c0_20] : memref<3x1x32xf32, #tpu.memory_space<vmem>>, vector<1x1x32xf32>
    %24 = vector.shape_cast %23 : vector<1x1x32xf32> to vector<1x32xf32>
    %25 = vector.broadcast %24 : vector<1x32xf32> to vector<2x32xf32>
    %26 = arith.addf %22, %25 : vector<2x32xf32>
    %cst_21 = arith.constant dense<0xFF800000> : vector<32xf32>
    %27 = vector.multi_reduction <maximumf>, %26, %cst_21 [0] : vector<2x32xf32> to vector<32xf32>
    %28 = vector.shape_cast %27 : vector<32xf32> to vector<1x32xf32>
    %29 = vector.broadcast %28 : vector<1x32xf32> to vector<2x32xf32>
    %30 = arith.subf %26, %29 : vector<2x32xf32>
    %31 = math.exp %30 : vector<2x32xf32>
    %cst_22 = arith.constant dense<0.000000e+00> : vector<32xf32>
    %32 = vector.multi_reduction <add>, %31, %cst_22 [0] : vector<2x32xf32> to vector<32xf32>
    %33 = vector.shape_cast %32 : vector<32xf32> to vector<1x32xf32>
    %34 = vector.broadcast %33 : vector<1x32xf32> to vector<2x32xf32>
    %35 = arith.divf %31, %34 : vector<2x32xf32>
    %c0_23 = arith.constant 0 : index
    %c0_24 = arith.constant 0 : index
    %36 = vector.load %arg3[%c0_23, %c0_24] : memref<2x32xf32, #tpu.memory_space<vmem>>, vector<2x32xf32>
    tpu.vector_store %arg3[%c0_23, %c0_24], %35 {strides = array<i32>} : memref<2x32xf32, #tpu.memory_space<vmem>>, vector<2x32xf32>,
    return
  }
}

</mosaic_0001>

<bundles_post_ra>
// kernel: policy_net_forward.1
= control target key start
LH: loop header
LB: loop body
LE: loop exit
PB: predicated region body
PF: predicated region fallthrough
CT: control target
= control target key end

     0   :  { %8 = vsyncpa [#allocation3], 0  ;;  %s572_s0 = inlined_call_operand.hbm [shape: f32[2,16], index: 0, kind: input, shape index: {}]   ;;  %s573_s1 = inlined_call_operand.hbm [shape: f32[3,32,32], index: 1, kind: input, shape index: {}]   ;;  %s574_s2 = inlined_call_operand.vmem [shape: f32[3,1,32], index: 2, kind: input, shape index: {}]   ;;  %s575_s3 = inlined_call_operand.hbm [shape: f32[2,32], index: 3, kind: output, shape index: {}]  }
   0x1   :  { %9 = vsyncpa [#allocation6], 0 }
   0x2   :  { %10 = vsyncpa [#allocation4], 0  ;;  %s486_s12 = smov [#allocation2]   ;;  %s487_s14 = smov [#allocation5]  }
   0x3   :  { %s17_s13 = sshll.u32 %s486_s12, 4  ;;  %s26_s15 = sshll.u32 %s487_s14, 4  ;;  %s18_s13 = int_to_ptr.vmem [resolvable:$true] %s17_s13  ;;  %s514_s15 = int_to_ptr.vmem [resolvable:$true] %s26_s15 }
   0x4   :  { %s414_s18 = scalar_lea.hbm %s572_s0, 32 }
   0x5   :  { %p415_p0 = scmp.ne.s32.totalorder %s572_s0, %s414_s18  ;;  %p418_p1 = scmp.lt.u32.totalorder %s414_s18, %s572_s0 }
   0x7   :  { %p420_p2 = pnand %p418_p1, %p415_p0 }
   0x9   :  { %423 = shalt.err (!%p420_p2)
}
   0xa   :  { %s424_s23 = scalar_lea.vmem %s18_s13, 32  ;;  %p429_p4 = scmp.lt.s32.totalorder %s18_s13, %s18_s13 }
   0xb   :  { %p425_p3 = scmp.ne.s32.totalorder %s18_s13, %s424_s23  ;;  %p430_p5 = scmp.lt.s32.totalorder %s424_s23, %s424_s23 }
   0xd   :  { %p431_p6 = por %p430_p5, %p429_p4 }
   0xf   :  { %p432_p7 = pnand %p431_p6, %p425_p3 }
  0x11   :  { %435 = shalt.err (!%p432_p7)
}
  0x12   :  { %20 = dma.hbm_to_vmem [thread:$0]  %s572_s0, 32, %s18_s13, [#allocation3]  }
  0x13   :  { %s436_s28 = scalar_lea.hbm %s573_s1, 1536 }
  0x14   :  { %p437_p8 = scmp.ne.s32.totalorder %s573_s1, %s436_s28  ;;  %p440_p9 = scmp.lt.u32.totalorder %s436_s28, %s573_s1 }
  0x16   :  { %p442_p10 = pnand %p440_p9, %p437_p8 }
  0x18   :  { %445 = shalt.err (!%p442_p10)
}
  0x19   :  { %s446_s6 = scalar_lea.vmem %s514_s15, 1536  ;;  %p451_p12 = scmp.lt.s32.totalorder %s514_s15, %s514_s15 }
  0x1a   :  { %p447_p11 = scmp.ne.s32.totalorder %s514_s15, %s446_s6  ;;  %p452_p13 = scmp.lt.s32.totalorder %s446_s6, %s446_s6 }
  0x1c   :  { %p453_p0 = por %p452_p13, %p451_p12 }
  0x1e   :  { %p454_p1 = pnand %p453_p0, %p447_p11 }
  0x20   :  { %457 = shalt.err (!%p454_p1)
}
  0x21   :  { %s488_s0 = smov 128   ;;  %s489_s7 = smov 8  }
  0x22   :  { %32 = dma.hbm_to_vmem [thread:$0]  %s573_s1, 1536, %s514_s15, [#allocation6], %s488_s0, %s488_s0, %s489_s7  }
  0x23   :  { %480 = dma.done.wait [#allocation3], 32  }
  0x24   :  { %481 = vsyncadd [#allocation3], 4294967264 }
  0x25   :  { %482 = dma.done.wait [#allocation6], 1536  }
  0x26   :  { %483 = vsyncadd [#allocation6], 4294965760  ;;  %v490_v0 = vmov 0.0|0.0   ;;  %vm491_vm0 = vmmov 0   ;;  %v492_v1 = vmov 0.0   ;;  %v42_v2 = vld [vmem:[#allocation5] sm:$0xff] }
  0x27   :  { %387 = vmatprep.subr.bf16.mxu0 %v490_v0  ;;  %362 = vmatprep.mubr.msk.f32.mxu0 %vm491_vm0, %v492_v1  ;;  %v43_v3 = vld [vmem:[#allocation5 + $0x8] sm:$0xff]  ;;  %v127_v5 = vld [vmem:[#allocation5 + $0x20] sm:$0xff]  ;;  %v41_v8 = vld [vmem:[#allocation2] sm:$0x3]  ;;  %vm51_vm1 = vcmask 130048   ;;  %vm139_vm2 = vcmask 261120  }
  0x28   :  { %390 = vmatprep.subr.bf16.mxu1 %v490_v0  ;;  %373 = vmatprep.mubr.msk.f32.mxu1 %vm491_vm0, %v492_v1  ;;  %v388_v4 = vpack.c.bf16 %v43_v3, %v42_v2  ;;  %v128_v6 = vld [vmem:[#allocation5 + $0x28] sm:$0xff]  ;;  %v129_v9 = vld [vmem:[#allocation5 + $0x30] sm:$0xff]  ;;  %v130_v10 = vld [vmem:[#allocation5 + $0x38] sm:$0xff]  ;;  %vm300_vm3 = vcmask 254976  }
  0x29   :  { %v391_v7 = vpack.c.bf16 %v128_v6, %v127_v5  ;;  %v394_v11 = vpack.c.bf16 %v130_v10, %v129_v9  ;;  %v215_v12 = vld [vmem:[#allocation5 + $0x40] sm:$0xff]  ;;  %v216_v13 = vld [vmem:[#allocation5 + $0x48] sm:$0xff]  ;;  %v337_v15 = vld [vmem:[%s574_s2] ss:$0 sm:$0xff] }
  0x2a   :  { %389 = vmatpush3.bf16.msra.mxu0 %v388_v4  ;;  %v397_v14 = vpack.c.bf16 %v216_v13, %v215_v12  ;;  %v217_v20 = vld [vmem:[#allocation5 + $0x50] sm:$0xff]  ;;  %v218_v21 = vld [vmem:[#allocation5 + $0x58] sm:$0xff] }
  0x2b   :  { %392 = vmatpush3.bf16.msra.mxu1 %v391_v7  ;;  %396 = vmatprep.subr.bf16.mxu0 %v490_v0  ;;  %v400_v22 = vpack.c.bf16 %v218_v21, %v217_v20  ;;  %v340_v23 = vld [vmem:[%s574_s2 + $0x1] ss:$0 sm:$0xff]  ;;  %v343_v28 = vld [vmem:[%s574_s2 + $0x2] ss:$0 sm:$0xff]  ;;  %s493_s2 = smov [#allocation7]  }
  0x2c   :  { %393 = vmatprep.subr.bf16.mxu1 %v490_v0  ;;  %s327_s15 = sshll.u32 %s493_s2, 4  ;;  %s328_s15 = int_to_ptr.vmem [resolvable:$true] %s327_s15 }
  0x2d   :  { %363 = vmatmul.mubr.msk.f32.vlgmr.msra.gmra.mrb[0].mxu0 %vm51_vm1, %v41_v8  ;;  %s458_s16 = scalar_lea.vmem %s328_s15, 32  ;;  %p463_p3 = scmp.lt.s32.totalorder %s328_s15, %s328_s15 }
  0x2e   :  { %384 = vmatprep.mubr.msk.f32.mxu0 %vm491_vm0, %v492_v1  ;;  %398 = vmatpush3.bf16.msra.mxu0 %v397_v14  ;;  %p459_p2 = scmp.ne.s32.totalorder %s328_s15, %s458_s16  ;;  %p464_p4 = scmp.lt.s32.totalorder %s458_s16, %s458_s16 }
  0x2f   :  { %395 = vmatpush3.bf16.msra.mxu1 %v394_v11  ;;  %399 = vmatprep.subr.bf16.mxu0 %v490_v0 }
  0x30   :  { %p465_p5 = por %p464_p4, %p463_p3 }
  0x32   :  { %401 = vmatpush3.bf16.msra.mxu0 %v400_v22  ;;  %p466_p6 = pnand %p465_p5, %p459_p2 }
 0x100   :  { %v121_v16 = vpop.f32.mrb[0].mxu0 }
 0x101   :  { %v122_v17 = vadd.f32 %v337_v15, %v121_v16  ;;  %v364_v18 = vpop.f32.mrb[1].mxu0 }
 0x103   :  { %v125_v19 = vmax.f32 %v122_v17, 0.0 }
 0x105   :  { %374 = vmatmul.mubr.msk.f32.vlgmr.msra.gmra.mrb[0].mxu1 %vm139_vm2, %v125_v19 }
 0x1d8   :  { %v209_v24 = vpop.f32.mrb[0].mxu1 }
 0x1d9   :  { %v210_v25 = vadd.f32 %v340_v23, %v209_v24  ;;  %v375_v26 = vpop.f32.mrb[1].mxu1 }
 0x1db   :  { %v213_v27 = vmax.f32 %v210_v25, 0.0 }
 0x1dd   :  { %385 = vmatmul.mubr.msk.f32.vlgmr.msra.gmra.mrb[2].mxu0 %vm139_vm2, %v213_v27 }
 0x2b0   :  { %v296_v29 = vpop.f32.mrb[2].mxu0 }
 0x2b1   :  { %v297_v30 = vadd.f32 %v343_v28, %v296_v29  ;;  %v386_v31 = vpop.f32.mrb[3].mxu0 }
 0x2b3   :  { %v301_v32 = vsel %vm300_vm3, %v297_v30, -inf }
 0x2b4   :  { %v302_v33 = vrot.slane %v301_v32, 4 }
 0x2b6   :  { %v303_v34 = vmax.f32 %v301_v32, %v302_v33 }
 0x2b8   :  { %v304_v35 = vrot.slane %v303_v34, 2 }
 0x2ba   :  { %v305_v36 = vmax.f32 %v303_v34, %v304_v35 }
 0x2bc   :  { %v306_v37 = vrot.slane %v305_v36, 1 }
 0x2be   :  { %v307_v38 = vmax.f32 %v305_v36, %v306_v37 }
 0x2c0   :  { %v308_v39 = vsub.f32 %v297_v30, %v307_v38 }
 0x2c2   :  { %v309_v40 = vmul.f32 1.442695, %v308_v39 }
 0x2c4   :  { %410 = vpow2.f32 %v309_v40 }
 0x2ce   :  { %v411_v41 = vpop.eup %410 }
 0x2cf   :  { %v311_v42 = vsel %vm300_vm3, %v411_v41, 0.0 }
 0x2d0   :  { %v312_v43 = vrot.slane %v311_v42, 4 }
 0x2d2   :  { %v313_v44 = vadd.f32 %v312_v43, %v311_v42 }
 0x2d4   :  { %v314_v45 = vrot.slane %v313_v44, 2 }
 0x2d6   :  { %v315_v46 = vadd.f32 %v314_v45, %v313_v44 }
 0x2d8   :  { %v316_v47 = vrot.slane %v315_v46, 1 }
 0x2da   :  { %v317_v48 = vadd.f32 %v316_v47, %v315_v46 }
 0x2dc   :  { %412 = vrcp.f32 %v317_v48 }
 0x2e6   :  { %v413_v49 = vpop.eup %412 }
 0x2e7   :  { %v319_v50 = vmul.f32 %v413_v49, %v411_v41 }
 0x2e9   :  { %320 = vst.msk [vmem:[#allocation7] sm:$0x3] %vm300_vm3, %v319_v50 }
 0x2ea   :  { %469 = shalt.err (!%p466_p6)
}
 0x2eb   :  { %s470_s19 = scalar_lea.hbm %s575_s3, 32 }
 0x2ec   :  { %p471_p7 = scmp.ne.s32.totalorder %s575_s3, %s470_s19  ;;  %p474_p8 = scmp.lt.u32.totalorder %s470_s19, %s575_s3 }
 0x2ee   :  { %p476_p9 = pnand %p474_p8, %p471_p7 }
 0x2f0   :  { %479 = shalt.err (!%p476_p9)
}
 0x2f1   :  { %330 = dma.vmem_to_hbm [thread:$0]  %s328_s15, 32, %s575_s3, [#allocation4]  }
 0x2f2   :  { %484 = dma.done.wait [#allocation4], 32  }
 0x2f3   :  { %485 = vsyncadd [#allocation4], 4294967264 }
 0x2f4   :  { %334 = vsyncpa [#allocation3], 1 }
 0x2f5   :  { %335 = vsyncpa [#allocation6], 1 }
 0x2f6   :  { %336 = vsyncpa [#allocation4], 1 }

</bundles_post_ra>
